<compile_context>
chip_gen: v6e
topology: v6e:2x2x1
jax: 0.10.0
libtpu: 0.0.40
codegen_flags: <defaults>
</compile_context>

<pallas_src>
import functools

import jax
import jax.numpy as jnp
from jax.experimental import pallas as pl
from jax.experimental.pallas import tpu as pltpu


def _causal_conv1d_kernel(x_ref, w_ref, b_ref, o_ref, *scratch, kernel_size,
                          dilation, pad, halo, fused):
    """One (batch, cout-tile, time-tile) grid step.  Time lives on lanes.

    x_ref   : (1, C_in, T_tile)       current x time tile
    w_ref   : (C_tile, K*C_in)        taps fused along the contraction axis
    b_ref   : (C_tile, 1)             bias
    o_ref   : (1, C_tile, T_tile)     output tile
    scratch : [win (C_in, halo+T_tile)] (+ [xk (K*C_in, T_tile)] if fused)
    """
    c_in = x_ref.shape[1]
    c_tile = o_ref.shape[1]
    t_tile = x_ref.shape[2]
    t = pl.program_id(2)

    if pad > 0:
        win_ref = scratch[0]

        # Refresh the causal left halo: zeros at the start of every
        # (batch, c-tile) time sweep, otherwise the trailing `halo` columns of
        # the previous step's window.  The RHS load materializes before the
        # store, so the (possibly overlapping) self-copy is safe.
        @pl.when(t == 0)
        def _():
            win_ref[:, :halo] = jnp.zeros((c_in, halo), dtype=win_ref.dtype)

        @pl.when(t > 0)
        def _():
            win_ref[:, :halo] = win_ref[:, t_tile:]

        # Append the incoming tile (halo is a 128-multiple -> aligned store).
        win_ref[:, halo:] = x_ref[0]

        base = halo - pad
        if fused:
            # im2col into a persistent scratch, one MXU matmul with
            # contraction K*C_in (row order k*C_in + c matches w_ref).
            xk_ref = scratch[1]
            for k in range(kernel_size):
                s = base + k * dilation
                xk_ref[k * c_in:(k + 1) * c_in, :] = win_ref[:, s:s + t_tile]
            acc = jnp.dot(w_ref[...], xk_ref[...],
                          preferred_element_type=jnp.float32)
        else:
            # Sublane-unaligned C_in: per-tap matmuls with f32 accumulation;
            # tap slices feed the MXU directly (no extra copies).
            acc = jnp.zeros((c_tile, t_tile), dtype=jnp.float32)
            for k in range(kernel_size):
                s = base + k * dilation
                acc = acc + jnp.dot(w_ref[:, k * c_in:(k + 1) * c_in],
                                    win_ref[:, s:s + t_tile],
                                    preferred_element_type=jnp.float32)
    else:
        # K == 1: plain 1x1 conv, no halo needed.
        acc = jnp.dot(w_ref[...], x_ref[0], preferred_element_type=jnp.float32)

    acc = acc + b_ref[...].astype(jnp.float32)
    o_ref[0] = acc.astype(o_ref.dtype)


def causal_conv1d(x, weight, bias=None, *, dilation=1, max_time_tile=None):
    """Causal dilated conv1d == PyTorch CausalConv1d.forward.

    x      : (B, C_in, T)        (PyTorch NCT layout)
    weight : (C_out, C_in, K)    (PyTorch Conv1d weight layout)
    bias   : (C_out,) or None
    returns: (B, C_out, T)
    """
    B, C_in, T = x.shape
    C_out, _, K = weight.shape
    pad = (K - 1) * dilation
    dt = x.dtype
    itemsize = jnp.dtype(dt).itemsize
    if bias is None:
        bias = jnp.zeros((C_out,), dtype=dt)

    # Fused im2col only when C_in is a multiple of the dtype's sublane pack
    # width (8 f32 / 16 bf16 / 32 int8); otherwise the K-way sublane stores
    # trigger repacking shuffles and per-tap matmuls are cheaper.
    pack = 8 * max(1, 4 // itemsize)
    fused = (K > 1) and (C_in % pack == 0)

    halo = ((pad + 127) // 128) * 128 if pad > 0 else 0

    # ---- generation-aware VMEM budget --------------------------------------
    try:
        info = pltpu.get_tpu_info()
        vmem_cap = int(getattr(info, "vmem_capacity_bytes", 0) or (64 << 20))
    except Exception:  # interpret mode / non-TPU backends
        vmem_cap = 64 << 20
    budget = int(0.6 * vmem_cap)

    # ---- C_out tiling (extra parallel axis: v7x dual-TC when B == 1, and it
    # keeps very large fused weights out of VMEM) -----------------------------
    c_tile = C_out
    if C_out % 128 == 0 and C_out >= 256:
        w_bytes = C_out * K * C_in * itemsize
        if B < 2:
            c_tile = 128
        elif 2 * w_bytes > budget // 2:
            c_tile = 256 if C_out % 256 == 0 else 128
    n_c = C_out // c_tile

    # ---- time tiling: largest 128-multiple whose working set fits ----------
    def _tile_bytes(tt):
        b = 2 * C_in * tt * itemsize            # double-buffered x block
        b += 2 * c_tile * tt * itemsize         # double-buffered output block
        b += C_in * (halo + tt) * itemsize      # window scratch
        if fused:
            b += K * C_in * tt * itemsize       # im2col scratch
        b += K * C_in * tt * itemsize           # tap-slice temporaries
        b += 4 * c_tile * tt                    # f32 accumulator
        return b

    fixed = 2 * c_tile * K * C_in * itemsize + 2 * c_tile * itemsize  # w + bias

    cands = [2048, 1024, 512, 256, 128]
    if max_time_tile is not None:
        cands = [c for c in cands if c <= max_time_tile] or [128]
    t_tile = cands[-1]
    for cand in cands:
        if fixed + _tile_bytes(cand) <= budget:
            t_tile = cand
            break
    if T <= t_tile:
        t_tile = T                      # single full-T tile, no padding at all
    n_t = pl.cdiv(T, t_tile)            # ragged last tile: Pallas masks writes

    need = fixed + _tile_bytes(t_tile)
    vmem_limit = int(min(max(need + (8 << 20), 32 << 20), int(0.9 * vmem_cap)))
    vmem_limit = int(min(max(vmem_limit, need + (2 << 20)), vmem_cap))

    # weight (C_out, C_in, K) -> (C_out, K*C_in): row order k*C_in + c matches
    # the in-kernel im2col / per-tap slicing.
    w2 = jnp.transpose(weight, (0, 2, 1)).reshape(C_out, K * C_in).astype(dt)
    b2 = bias.reshape(C_out, 1)

    kernel = functools.partial(_causal_conv1d_kernel, kernel_size=K,
                               dilation=dilation, pad=pad, halo=halo,
                               fused=fused)

    scratch_shapes = []
    if pad > 0:
        scratch_shapes.append(pltpu.VMEM((C_in, halo + t_tile), dt))
        if fused:
            scratch_shapes.append(pltpu.VMEM((K * C_in, t_tile), dt))

    cost = pl.CostEstimate(
        flops=2 * B * T * K * C_in * C_out,
        transcendentals=0,
        bytes_accessed=(x.size + w2.size + b2.size + B * C_out * T) * itemsize,
    )

    def _call(use_single_buffer):
        if use_single_buffer and n_c == 1:
            # Constant-index blocks: single buffering halves their residency.
            w_spec = pl.BlockSpec((c_tile, K * C_in), lambda b, c, t: (c, 0),
                                  pipeline_mode=pl.Buffered(1))
            b_spec = pl.BlockSpec((c_tile, 1), lambda b, c, t: (c, 0),
                                  pipeline_mode=pl.Buffered(1))
        else:
            w_spec = pl.BlockSpec((c_tile, K * C_in), lambda b, c, t: (c, 0))
            b_spec = pl.BlockSpec((c_tile, 1), lambda b, c, t: (c, 0))

        return pl.pallas_call(
            kernel,
            out_shape=jax.ShapeDtypeStruct((B, C_out, T), dt),
            grid_spec=pltpu.PrefetchScalarGridSpec(
                num_scalar_prefetch=0,
                grid=(B, n_c, n_t),
                in_specs=[
                    pl.BlockSpec((1, C_in, t_tile), lambda b, c, t: (b, 0, t)),
                    w_spec,
                    b_spec,
                ],
                out_specs=pl.BlockSpec((1, c_tile, t_tile),
                                       lambda b, c, t: (b, c, t)),
                scratch_shapes=scratch_shapes,
            ),
            compiler_params=pltpu.CompilerParams(
                # Time must be sequential ("arbitrary") for the halo carry;
                # batch and c-tile are "parallel" (sweeps are independent
                # because the carry is reset at t == 0 for every (b, c)).
                dimension_semantics=("parallel", "parallel", "arbitrary"),
                vmem_limit_bytes=vmem_limit,
            ),
            cost_estimate=cost,
        )(x, w2, b2)

    try:
        return _call(True)
    except Exception:
        # pipeline_mode=pl.Buffered(1) unsupported on this JAX/libtpu combo:
        # retry with default double-buffering (perf-only fallback).
        return _call(False)


def _reference_causal_conv1d(x, weight, bias, *, dilation):
    """Pure-JAX reference (matches PyTorch forward)."""
    K = weight.shape[-1]
    pad = (K - 1) * dilation
    y = jax.lax.conv_general_dilated(
        x.astype(jnp.float32),
        weight.astype(jnp.float32),
        window_strides=(1,),
        padding=[(pad, pad)],
        rhs_dilation=(dilation,),
        dimension_numbers=("NCH", "OIH", "NCH"),
    )
    y = y + bias.astype(jnp.float32)[None, :, None]
    if pad != 0:
        y = y[:, :, :-pad]
    return y.astype(x.dtype)


def _check(B, C_in, C_out, T, K, dilation, *, max_time_tile=None, seed=0):
    key = jax.random.PRNGKey(seed)
    kx, kw, kb = jax.random.split(key, 3)
    x = jax.random.normal(kx, (B, C_in, T), dtype=jnp.float32)
    weight = jax.random.normal(kw, (C_out, C_in, K), dtype=jnp.float32) * 0.1
    bias = jax.random.normal(kb, (C_out,), dtype=jnp.float32) * 0.1

    y = causal_conv1d(x, weight, bias, dilation=dilation,
                      max_time_tile=max_time_tile)
    y = jax.block_until_ready(y)
    y_ref = _reference_causal_conv1d(x, weight, bias, dilation=dilation)
    assert y.shape == (B, C_out, T), (y.shape, (B, C_out, T))
    err = float(jnp.max(jnp.abs(y - y_ref)))
    assert jnp.allclose(y, y_ref, atol=1e-4, rtol=1e-4), err


if __name__ == "__main__":
    # Primary small case consistent with the module: (B x C x T).
    _check(B=2, C_in=4, C_out=6, T=16, K=3, dilation=2)
    # Multi time-tile path: halo carried across tiles, fused im2col (C_in % 8 == 0).
    _check(B=2, C_in=8, C_out=16, T=384, K=3, dilation=16, max_time_tile=128)
    # Halo longer than a tile + ragged trailing time tile (no jnp.pad, masked writes).
    _check(B=1, C_in=8, C_out=8, T=200, K=2, dilation=160, max_time_tile=128)
    print("KERNEL_OK")
</pallas_src>

<mosaic_0001>
module attributes {stable_mosaic.version = 11 : i64} {
  func.func @_causal_conv1d_kernel(%arg0: i32, %arg1: i32, %arg2: i32, %arg3: memref<1x4x16xf32, #tpu.memory_space<vmem>>, %arg4: memref<6x12xf32, #tpu.memory_space<vmem>>, %arg5: memref<6x1xf32, #tpu.memory_space<vmem>>, %arg6: memref<1x6x16xf32, #tpu.memory_space<vmem>>, %arg7: memref<4x144xf32, #tpu.memory_space<vmem>>) attributes {dimension_semantics = [#tpu.dimension_semantics<parallel>, #tpu.dimension_semantics<parallel>, #tpu.dimension_semantics<arbitrary>], iteration_bounds = array<i64: 2, 1, 1>, scalar_prefetch = 0 : i64, scratch_operands = 1 : i64, tpu.core_type = #tpu.core_type<tc>, window_params = [{transform_indices = @transform_0, window_bounds = array<i64: 1, 4, 16>}, {pipeline_mode = #tpu.pipeline_mode<synchronous>, transform_indices = @transform_1, window_bounds = array<i64: 6, 12>}, {pipeline_mode = #tpu.pipeline_mode<synchronous>, transform_indices = @transform_2, window_bounds = array<i64: 6, 1>}, {transform_indices = @transform_3, window_bounds = array<i64: 1, 6, 16>}]} {
    %c0_i32 = arith.constant 0 : i32
    %0 = arith.cmpi eq, %arg2, %c0_i32 : i32
    %1 = arith.extui %0 : i1 to i32
    %c0_i32_0 = arith.constant 0 : i32
    %2 = arith.cmpi ne, %1, %c0_i32_0 : i32
    scf.if %2 {
      %cst_22 = arith.constant 0.000000e+00 : f32
      %28 = vector.broadcast %cst_22 : f32 to vector<4x128xf32>
      %c0_23 = arith.constant 0 : index
      %c0_24 = arith.constant 0 : index
      %29 = vector.load %arg7[%c0_23, %c0_24] : memref<4x144xf32, #tpu.memory_space<vmem>>, vector<4x128xf32>
      tpu.vector_store %arg7[%c0_23, %c0_24], %28 {strides = array<i32>} : memref<4x144xf32, #tpu.memory_space<vmem>>, vector<4x128xf32>,
    } else {
    }
    %c0_i32_1 = arith.constant 0 : i32
    %3 = arith.cmpi sgt, %arg2, %c0_i32_1 : i32
    %4 = arith.extui %3 : i1 to i32
    %c0_i32_2 = arith.constant 0 : i32
    %5 = arith.cmpi ne, %4, %c0_i32_2 : i32
    scf.if %5 {
      %c0_22 = arith.constant 0 : index
      %c16 = arith.constant 16 : index
      %28 = vector.load %arg7[%c0_22, %c16] : memref<4x144xf32, #tpu.memory_space<vmem>>, vector<4x128xf32>
      %c0_23 = arith.constant 0 : index
      %c0_24 = arith.constant 0 : index
      %29 = vector.load %arg7[%c0_23, %c0_24] : memref<4x144xf32, #tpu.memory_space<vmem>>, vector<4x128xf32>
      tpu.vector_store %arg7[%c0_23, %c0_24], %28 {strides = array<i32>} : memref<4x144xf32, #tpu.memory_space<vmem>>, vector<4x128xf32>,
    } else {
    }
    %c0 = arith.constant 0 : index
    %c0_3 = arith.constant 0 : index
    %c0_4 = arith.constant 0 : index
    %6 = vector.load %arg3[%c0, %c0_3, %c0_4] : memref<1x4x16xf32, #tpu.memory_space<vmem>>, vector<1x4x16xf32>
    %7 = vector.shape_cast %6 : vector<1x4x16xf32> to vector<4x16xf32>
    %c0_5 = arith.constant 0 : index
    %c128 = arith.constant 128 : index
    %8 = vector.load %arg7[%c0_5, %c128] : memref<4x144xf32, #tpu.memory_space<vmem>>, vector<4x16xf32>
    tpu.vector_store %arg7[%c0_5, %c128], %7 {strides = array<i32>} : memref<4x144xf32, #tpu.memory_space<vmem>>, vector<4x16xf32>,
    %cst = arith.constant 0.000000e+00 : f32
    %9 = vector.broadcast %cst : f32 to vector<6x16xf32>
    %c0_6 = arith.constant 0 : index
    %c0_7 = arith.constant 0 : index
    %10 = vector.load %arg4[%c0_6, %c0_7] : memref<6x12xf32, #tpu.memory_space<vmem>>, vector<6x4xf32>
    %c0_8 = arith.constant 0 : index
    %c124 = arith.constant 124 : index
    %11 = vector.load %arg7[%c0_8, %c124] : memref<4x144xf32, #tpu.memory_space<vmem>>, vector<4x16xf32>
    %cst_9 = arith.constant dense<0.000000e+00> : vector<6x16xf32>
    %12 = tpu.matmul %10, %11, %cst_9 {dimension_numbers = #tpu.dot_dimension_numbers<[1], [0], [0], [1], [0, 0, 1, 1], [], []>} : vector<6x4xf32>, vector<4x16xf32>, vector<6x16xf32> -> vector<6x16xf32>
    %13 = arith.addf %9, %12 : vector<6x16xf32>
    %c0_10 = arith.constant 0 : index
    %c4 = arith.constant 4 : index
    %14 = vector.load %arg4[%c0_10, %c4] : memref<6x12xf32, #tpu.memory_space<vmem>>, vector<6x4xf32>
    %c0_11 = arith.constant 0 : index
    %c126 = arith.constant 126 : index
    %15 = vector.load %arg7[%c0_11, %c126] : memref<4x144xf32, #tpu.memory_space<vmem>>, vector<4x16xf32>
    %cst_12 = arith.constant dense<0.000000e+00> : vector<6x16xf32>
    %16 = tpu.matmul %14, %15, %cst_12 {dimension_numbers = #tpu.dot_dimension_numbers<[1], [0], [0], [1], [0, 0, 1, 1], [], []>} : vector<6x4xf32>, vector<4x16xf32>, vector<6x16xf32> -> vector<6x16xf32>
    %17 = arith.addf %13, %16 : vector<6x16xf32>
    %c0_13 = arith.constant 0 : index
    %c8 = arith.constant 8 : index
    %18 = vector.load %arg4[%c0_13, %c8] : memref<6x12xf32, #tpu.memory_space<vmem>>, vector<6x4xf32>
    %c0_14 = arith.constant 0 : index
    %c128_15 = arith.constant 128 : index
    %19 = vector.load %arg7[%c0_14, %c128_15] : memref<4x144xf32, #tpu.memory_space<vmem>>, vector<4x16xf32>
    %cst_16 = arith.constant dense<0.000000e+00> : vector<6x16xf32>
    %20 = tpu.matmul %18, %19, %cst_16 {dimension_numbers = #tpu.dot_dimension_numbers<[1], [0], [0], [1], [0, 0, 1, 1], [], []>} : vector<6x4xf32>, vector<4x16xf32>, vector<6x16xf32> -> vector<6x16xf32>
    %21 = arith.addf %17, %20 : vector<6x16xf32>
    %c0_17 = arith.constant 0 : index
    %c0_18 = arith.constant 0 : index
    %22 = vector.load %arg5[%c0_17, %c0_18] : memref<6x1xf32, #tpu.memory_space<vmem>>, vector<6x1xf32>
    %23 = vector.broadcast %22 : vector<6x1xf32> to vector<6x16xf32>
    %24 = arith.addf %21, %23 : vector<6x16xf32>
    %c0_19 = arith.constant 0 : index
    %c0_20 = arith.constant 0 : index
    %c0_21 = arith.constant 0 : index
    %25 = vector.load %arg6[%c0_19, %c0_20, %c0_21] : memref<1x6x16xf32, #tpu.memory_space<vmem>>, vector<1x6x16xf32>
    %26 = vector.shape_cast %25 : vector<1x6x16xf32> to vector<6x16xf32>
    %27 = vector.shape_cast %24 : vector<6x16xf32> to vector<1x6x16xf32>
    tpu.vector_store %arg6[%c0_19, %c0_20, %c0_21], %27 {strides = array<i32>} : memref<1x6x16xf32, #tpu.memory_space<vmem>>, vector<1x6x16xf32>,
    return
  }
  func.func @transform_0(%arg0: i32, %arg1: i32, %arg2: i32) -> (i32, i32, i32) {
    %c0_i32 = arith.constant 0 : i32
    %c0_i32_0 = arith.constant 0 : i32
    return %arg0, %c0_i32, %arg2 : i32, i32, i32
  }
  func.func @transform_1(%arg0: i32, %arg1: i32, %arg2: i32) -> (i32, i32) {
    %c0_i32 = arith.constant 0 : i32
    %c0_i32_0 = arith.constant 0 : i32
    return %arg1, %c0_i32 : i32, i32
  }
  func.func @transform_2(%arg0: i32, %arg1: i32, %arg2: i32) -> (i32, i32) {
    %c0_i32 = arith.constant 0 : i32
    %c0_i32_0 = arith.constant 0 : i32
    return %arg1, %c0_i32 : i32, i32
  }
  func.func @transform_3(%arg0: i32, %arg1: i32, %arg2: i32) -> (i32, i32, i32) {
    %c0_i32 = arith.constant 0 : i32
    return %arg0, %arg1, %arg2 : i32, i32, i32
  }
}

module attributes {stable_mosaic.version = 11 : i64} {
  func.func @_causal_conv1d_kernel(%arg0: i32, %arg1: i32, %arg2: i32, %arg3: memref<1x4x16xf32, #tpu.memory_space<vmem>>, %arg4: memref<6x12xf32, #tpu.memory_space<vmem>>, %arg5: memref<6x1xf32, #tpu.memory_space<vmem>>, %arg6: memref<1x6x16xf32, #tpu.memory_space<vmem>>, %arg7: memref<4x144xf32, #tpu.memory_space<vmem>>) attributes {dimension_semantics = [#tpu.dimension_semantics<parallel>, #tpu.dimension_semantics<parallel>, #tpu.dimension_semantics<arbitrary>], iteration_bounds = array<i64: 2, 1, 1>, scalar_prefetch = 0 : i64, scratch_operands = 1 : i64, tpu.core_type = #tpu.core_type<tc>, window_params = [{transform_indices = @transform_0, window_bounds = array<i64: 1, 4, 16>}, {transform_indices = @transform_1, window_bounds = array<i64: 6, 12>}, {transform_indices = @transform_2, window_bounds = array<i64: 6, 1>}, {transform_indices = @transform_3, window_bounds = array<i64: 1, 6, 16>}]} {
    %c0_i32 = arith.constant 0 : i32
    %0 = arith.cmpi eq, %arg2, %c0_i32 : i32
    %1 = arith.extui %0 : i1 to i32
    %c0_i32_0 = arith.constant 0 : i32
    %2 = arith.cmpi ne, %1, %c0_i32_0 : i32
    scf.if %2 {
      %cst_22 = arith.constant 0.000000e+00 : f32
      %28 = vector.broadcast %cst_22 : f32 to vector<4x128xf32>
      %c0_23 = arith.constant 0 : index
      %c0_24 = arith.constant 0 : index
      %29 = vector.load %arg7[%c0_23, %c0_24] : memref<4x144xf32, #tpu.memory_space<vmem>>, vector<4x128xf32>
      tpu.vector_store %arg7[%c0_23, %c0_24], %28 {strides = array<i32>} : memref<4x144xf32, #tpu.memory_space<vmem>>, vector<4x128xf32>,
    } else {
    }
    %c0_i32_1 = arith.constant 0 : i32
    %3 = arith.cmpi sgt, %arg2, %c0_i32_1 : i32
    %4 = arith.extui %3 : i1 to i32
    %c0_i32_2 = arith.constant 0 : i32
    %5 = arith.cmpi ne, %4, %c0_i32_2 : i32
    scf.if %5 {
      %c0_22 = arith.constant 0 : index
      %c16 = arith.constant 16 : index
      %28 = vector.load %arg7[%c0_22, %c16] : memref<4x144xf32, #tpu.memory_space<vmem>>, vector<4x128xf32>
      %c0_23 = arith.constant 0 : index
      %c0_24 = arith.constant 0 : index
      %29 = vector.load %arg7[%c0_23, %c0_24] : memref<4x144xf32, #tpu.memory_space<vmem>>, vector<4x128xf32>
      tpu.vector_store %arg7[%c0_23, %c0_24], %28 {strides = array<i32>} : memref<4x144xf32, #tpu.memory_space<vmem>>, vector<4x128xf32>,
    } else {
    }
    %c0 = arith.constant 0 : index
    %c0_3 = arith.constant 0 : index
    %c0_4 = arith.constant 0 : index
    %6 = vector.load %arg3[%c0, %c0_3, %c0_4] : memref<1x4x16xf32, #tpu.memory_space<vmem>>, vector<1x4x16xf32>
    %7 = vector.shape_cast %6 : vector<1x4x16xf32> to vector<4x16xf32>
    %c0_5 = arith.constant 0 : index
    %c128 = arith.constant 128 : index
    %8 = vector.load %arg7[%c0_5, %c128] : memref<4x144xf32, #tpu.memory_space<vmem>>, vector<4x16xf32>
    tpu.vector_store %arg7[%c0_5, %c128], %7 {strides = array<i32>} : memref<4x144xf32, #tpu.memory_space<vmem>>, vector<4x16xf32>,
    %cst = arith.constant 0.000000e+00 : f32
    %9 = vector.broadcast %cst : f32 to vector<6x16xf32>
    %c0_6 = arith.constant 0 : index
    %c0_7 = arith.constant 0 : index
    %10 = vector.load %arg4[%c0_6, %c0_7] : memref<6x12xf32, #tpu.memory_space<vmem>>, vector<6x4xf32>
    %c0_8 = arith.constant 0 : index
    %c124 = arith.constant 124 : index
    %11 = vector.load %arg7[%c0_8, %c124] : memref<4x144xf32, #tpu.memory_space<vmem>>, vector<4x16xf32>
    %cst_9 = arith.constant dense<0.000000e+00> : vector<6x16xf32>
    %12 = tpu.matmul %10, %11, %cst_9 {dimension_numbers = #tpu.dot_dimension_numbers<[1], [0], [0], [1], [0, 0, 1, 1], [], []>} : vector<6x4xf32>, vector<4x16xf32>, vector<6x16xf32> -> vector<6x16xf32>
    %13 = arith.addf %9, %12 : vector<6x16xf32>
    %c0_10 = arith.constant 0 : index
    %c4 = arith.constant 4 : index
    %14 = vector.load %arg4[%c0_10, %c4] : memref<6x12xf32, #tpu.memory_space<vmem>>, vector<6x4xf32>
    %c0_11 = arith.constant 0 : index
    %c126 = arith.constant 126 : index
    %15 = vector.load %arg7[%c0_11, %c126] : memref<4x144xf32, #tpu.memory_space<vmem>>, vector<4x16xf32>
    %cst_12 = arith.constant dense<0.000000e+00> : vector<6x16xf32>
    %16 = tpu.matmul %14, %15, %cst_12 {dimension_numbers = #tpu.dot_dimension_numbers<[1], [0], [0], [1], [0, 0, 1, 1], [], []>} : vector<6x4xf32>, vector<4x16xf32>, vector<6x16xf32> -> vector<6x16xf32>
    %17 = arith.addf %13, %16 : vector<6x16xf32>
    %c0_13 = arith.constant 0 : index
    %c8 = arith.constant 8 : index
    %18 = vector.load %arg4[%c0_13, %c8] : memref<6x12xf32, #tpu.memory_space<vmem>>, vector<6x4xf32>
    %c0_14 = arith.constant 0 : index
    %c128_15 = arith.constant 128 : index
    %19 = vector.load %arg7[%c0_14, %c128_15] : memref<4x144xf32, #tpu.memory_space<vmem>>, vector<4x16xf32>
    %cst_16 = arith.constant dense<0.000000e+00> : vector<6x16xf32>
    %20 = tpu.matmul %18, %19, %cst_16 {dimension_numbers = #tpu.dot_dimension_numbers<[1], [0], [0], [1], [0, 0, 1, 1], [], []>} : vector<6x4xf32>, vector<4x16xf32>, vector<6x16xf32> -> vector<6x16xf32>
    %21 = arith.addf %17, %20 : vector<6x16xf32>
    %c0_17 = arith.constant 0 : index
    %c0_18 = arith.constant 0 : index
    %22 = vector.load %arg5[%c0_17, %c0_18] : memref<6x1xf32, #tpu.memory_space<vmem>>, vector<6x1xf32>
    %23 = vector.broadcast %22 : vector<6x1xf32> to vector<6x16xf32>
    %24 = arith.addf %21, %23 : vector<6x16xf32>
    %c0_19 = arith.constant 0 : index
    %c0_20 = arith.constant 0 : index
    %c0_21 = arith.constant 0 : index
    %25 = vector.load %arg6[%c0_19, %c0_20, %c0_21] : memref<1x6x16xf32, #tpu.memory_space<vmem>>, vector<1x6x16xf32>
    %26 = vector.shape_cast %25 : vector<1x6x16xf32> to vector<6x16xf32>
    %27 = vector.shape_cast %24 : vector<6x16xf32> to vector<1x6x16xf32>
    tpu.vector_store %arg6[%c0_19, %c0_20, %c0_21], %27 {strides = array<i32>} : memref<1x6x16xf32, #tpu.memory_space<vmem>>, vector<1x6x16xf32>,
    return
  }
  func.func @transform_0(%arg0: i32, %arg1: i32, %arg2: i32) -> (i32, i32, i32) {
    %c0_i32 = arith.constant 0 : i32
    %c0_i32_0 = arith.constant 0 : i32
    return %arg0, %c0_i32, %arg2 : i32, i32, i32
  }
  func.func @transform_1(%arg0: i32, %arg1: i32, %arg2: i32) -> (i32, i32) {
    %c0_i32 = arith.constant 0 : i32
    %c0_i32_0 = arith.constant 0 : i32
    return %arg1, %c0_i32 : i32, i32
  }
  func.func @transform_2(%arg0: i32, %arg1: i32, %arg2: i32) -> (i32, i32) {
    %c0_i32 = arith.constant 0 : i32
    %c0_i32_0 = arith.constant 0 : i32
    return %arg1, %c0_i32 : i32, i32
  }
  func.func @transform_3(%arg0: i32, %arg1: i32, %arg2: i32) -> (i32, i32, i32) {
    %c0_i32 = arith.constant 0 : i32
    return %arg0, %arg1, %arg2 : i32, i32, i32
  }
}

</mosaic_0001>

<bundles_post_ra>
// kernel: tpu_custom_call.1
= control target key start
LH: loop header
LB: loop body
LE: loop exit
PB: predicated region body
PF: predicated region fallthrough
CT: control target
= control target key end

     0   :  { %8 = vsyncpa [#allocation4], 0  ;;  %s810_s12 = smov 0   ;;  %s812_s13 = smov 0   ;;  %s879_s0 = inlined_call_operand.vmem [shape: f32[2,4,16], index: 0, kind: input, shape index: {}]   ;;  %s880_s1 = inlined_call_operand.hbm [shape: f32[6,12], index: 1, kind: input, shape index: {}]   ;;  %s881_s2 = inlined_call_operand.vmem [shape: f32[6,1], index: 2, kind: input, shape index: {}]   ;;  %s882_s3 = inlined_call_operand.vmem [shape: f32[2,6,16], index: 3, kind: output, shape index: {}]  }
   0x1   :  { %s814_s14 = smov 0  }
   0x2 LB: > { %s645_s15 = sadd.s32 4294967295, %s780_s14   ;;  %s33_s16 = sadd.s32 1, %s776_s13  ;;  %s780_s14 = sphi %s814_s14, %s14_s14   ;;  %s776_s13 = sphi %s812_s13, %s886_s13   ;;  %s772_s12 = sphi %s810_s12, %s885_s12  }
   0x3   : > { %p35_p0 = scmp.ge.s32.totalorder %s33_s16, 2  ;;  %p647_p1 = scmp.ge.s32.totalorder %s780_s14, 1 }
   0x4   : > { %p148_p2 = scmp.lt.s32.totalorder %s780_s14, 3  ;;  %p835_p4 = scmp.eq.s32.totalorder %s645_s15, 0 }
   0x5   : > { %s888_s16 = smov (%p35_p0, %s33_s16), 0  ;;  %s782_s19 = smov [#allocation3]  }
   0x6   : > { %p831_p3 = pnand %p647_p1, %p148_p2  ;;  %s163_s20 = sshll.u32 %s782_s19, 4  ;;  %s164_s20 = int_to_ptr.vmem [resolvable:$true] %s163_s20 }
   0x7   : > { %s739_s21 = scalar_lea.vmem %s164_s20, 128  ;;  %p747_p11 = scmp.lt.s32.totalorder %s164_s20, %s164_s20 }
   0x8   : > { %p688_p5 = pneg %p831_p3  ;;  %p740_p8 = scmp.ne.s32.totalorder %s164_s20, %s739_s21 }
   0x9   : > { %p748_p12 = scmp.lt.s32.totalorder %s739_s21, %s739_s21 }
   0xa   : > { %p689_p6 = pnand %p835_p4, %p688_p5 }
   0xb   : > { %p749_p13 = por %p748_p12, %p747_p11 }
   0xc   : > { %p730_p7 = pneg %p689_p6 }
   0xe   : > { %p742_p9 = pnand %p740_p8, %p730_p7 }
  0x10   : > { %p743_p10 = pneg %p742_p9 }
  0x12   : > { %p750_p0 = pnand %p749_p13, %p743_p10 }
  0x14   : > { %753 = shalt.err (!%p750_p0)
}
  0x15   : > { %691 = dma.hbm_to_vmem [thread:$0]  (!%p689_p6), %s880_s1, 128, %s164_s20, [#allocation4]  }
  0x16   : > { %193 = sbr.rel (%p831_p3) target bundleno = 367 (0x16f), region = 32 }
  0x1b   : > { %767 = dma.done.wait (%p835_p4), [#allocation4], 128  }
  0x1c   : > { %769 = vsyncadd (%p835_p4), [#allocation4], 4294967168  ;;  %p228_p1 = scmp.lt.s32.totalorder %s772_s12, 1  ;;  %v783_v0 = vmov 0.0   ;;  %vm268_vm0 = vcmask 125952   ;;  %vm784_vm1 = vmmov 0  }
  0x1d   : > { %253 = vst [vmem:[#allocation2] sm:$0xf] %v783_v0  ;;  %669 = vmatprep.subr.mxu0 %v783_v0  ;;  %674 = vmatprep.subr.mxu1 %v783_v0  ;;  %v270_v2 = vld [vmem:[#allocation3] sm:$0x3f]  ;;  %s785_s28 = smov 124   ;;  %v786_v3 = vmov 0  }
  0x1e   : > { %s890_s12 = smov (!%p228_p1, %s772_s12), 1  ;;  %671 = vmatprep.mubr.msk.f32.mxu0 %vm784_vm1, %v783_v0  ;;  %676 = vmatprep.mubr.msk.f32.mxu1 %vm784_vm1, %v783_v0  ;;  %s787_s29 = smov 2   ;;  %v438_v6 = vld [vmem:[#allocation3] sm:$0x3f]  ;;  %v519_v7 = vld [vmem:[%s881_s2] sm:$0x3f] }
  0x1f   : > { %s653_s24 = sshll.u32 %s890_s12, 2  ;;  %273 = vrot.lane.b32.xlu1 %v270_v2, %s785_s28  ;;  %726 = vset.pattern.permute.xlu0 %v786_v3  ;;  %s788_s30 = smov 4   ;;  %vm281_vm2 = vcmask 15360   ;;  %vm286_vm3 = vcmask 1043456   ;;  %vm283_vm4 = vcmask 31744   ;;  %vm526_vm5 = vcmask 128000  }
  0x20   : > { %s234_s27 = scalar_lea.vmem %s879_s0, %s653_s24  ;;  %s789_s4 = smov 120  }
  0x21   : > { %v267_v1 = vld [vmem:[%s234_s27] sm:$0xf]  ;;  %s654_s7 = sshll.u32 %s890_s12, 3 }
  0x22   : > { %269 = vst.msk [vmem:[#allocation2 + $0x4] sm:$0xf] %vm268_vm0, %v267_v1  ;;  %s248_s10 = scalar_lea.vmem %s882_s3, %s654_s7 }
  0x29   : > { %v271_v4 = vld [vmem:[#allocation2] sm:$0xff] }
  0x2a   : > { %277 = vrot.lane.b32.xlu0 %v271_v4, %s787_s29  ;;  %v276_v5 = vcombine.high %v271_v4, %v271_v4  ;;  %359 = vrot.lane.b32.xlu1 %v271_v4, %s788_s30  ;;  %v439_v13 = vld [vmem:[#allocation2 + $0x4] sm:$0xf] }
  0x2e   : > { %279 = vrot.lane.b32.xlu0 %v276_v5, %s787_s29  ;;  %441 = vrot.lane.b32.xlu1 %v438_v6, %s789_s4 }
  0x32   : > { %361 = vrot.lane.b32.xlu0 %v276_v5, %s788_s30 }
  0x36   : > { %522 = vperm.xlu0 %726, %v519_v7  }
  0x91   : > { %v274_v8 = vpop.permute.xlu1 %273 }
  0x9c   : > { %v278_v9 = vpop.permute.xlu0 %277  ;;  %v360_v10 = vpop.permute.xlu1 %359 }
  0xa0   : > { %v280_v11 = vpop.permute.xlu0 %279  ;;  %v442_v15 = vpop.permute.xlu1 %441 }
  0xa1   : > { %v282_v12 = vsel %vm281_vm2, %v278_v9, %v280_v11 }
  0xa2   : > { %670 = vmatpush3.msk.msra.mxu0 %vm286_vm3, %v282_v12 }
  0xa3   : > { %672 = vmatmul.mubr.msk.f32.vlgmr.msra.gmra.mxu0 %vm283_vm4, %v274_v8  ;;  %679 = vmatprep.subr.mxu0 %v783_v0 }
  0xa4   : > { %v362_v14 = vpop.permute.xlu0 %361  ;;  %680 = vmatpush3.msk.msra.mxu0 %vm286_vm3, %v439_v13  ;;  %681 = vmatprep.mubr.msk.f32.mxu0 %vm784_vm1, %v783_v0 }
  0xa5   : > { %v363_v16 = vsel %vm283_vm4, %v360_v10, %v362_v14 }
  0xa6   : > { %675 = vmatpush3.msk.msra.mxu1 %vm286_vm3, %v363_v16 }
  0xa7   : > { %677 = vmatmul.mubr.msk.f32.vlgmr.msra.gmra.mxu1 %vm283_vm4, %v270_v2  ;;  %682 = vmatmul.mubr.msk.f32.vlgmr.msra.gmra.mxu0 %vm283_vm4, %v442_v15 }
  0xb1   : > { %v523_v22 = vpop.permute.xlu0 %522 }
 0x163   : > { %v355_v17 = vpop.f32.mrf.mxu0 }
 0x165   : > { %v673_v18 = vpop.f32.mrf.mxu0 }
 0x167   : > { %v434_v19 = vpop.f32.mrf.mxu1  ;;  %v514_v20 = vpop.f32.mrf.mxu0 }
 0x168   : > { %v435_v21 = vadd.f32 %v434_v19, %v355_v17 }
 0x169   : > { %v678_v23 = vpop.f32.mrf.mxu1  ;;  %v683_v24 = vpop.f32.mrf.mxu0 }
 0x16a   : > { %v518_v25 = vadd.f32 %v514_v20, %v435_v21 }
 0x16c   : > { %v525_v26 = vadd.f32 %v523_v22, %v518_v25 }
 0x16e   : > { %527 = vst.msk [vmem:[%s248_s10] sm:$0x3f] %vm526_vm5, %v525_v26 }
 0x16f PF: > { %s14_s14 = sadd.s32 1, %s780_s14   ;;  %s885_s12 = smov %s776_s13 }
 0x170   : > { %p11_p2 = scmp.ge.s32.totalorder %s14_s14, 4   ;;  %s886_s13 = smov %s888_s16 }
 0x172   :  { %13 = sbr.rel (!%p11_p2) target bundleno = 2 (0x2), region = 79 }
 0x177   :  { %559 = vsyncpa [#allocation4], 1 }
 0x178   :  { %561 = vsyncpa [#allocation4 + $0x1], 1 }

// kernel: tpu_custom_call.1
= control target key start
LH: loop header
LB: loop body
LE: loop exit
PB: predicated region body
PF: predicated region fallthrough
CT: control target
= control target key end

     0   :  { %8 = vsyncpa [#allocation4], 0  ;;  %s810_s12 = smov 0   ;;  %s812_s13 = smov 0   ;;  %s879_s0 = inlined_call_operand.vmem [shape: f32[2,4,16], index: 0, kind: input, shape index: {}]   ;;  %s880_s1 = inlined_call_operand.hbm [shape: f32[6,12], index: 1, kind: input, shape index: {}]   ;;  %s881_s2 = inlined_call_operand.vmem [shape: f32[6,1], index: 2, kind: input, shape index: {}]   ;;  %s882_s3 = inlined_call_operand.vmem [shape: f32[2,6,16], index: 3, kind: output, shape index: {}]  }
   0x1   :  { %s814_s14 = smov 0  }
   0x2 LB: > { %s645_s15 = sadd.s32 4294967295, %s780_s14   ;;  %s33_s16 = sadd.s32 1, %s776_s13  ;;  %s780_s14 = sphi %s814_s14, %s14_s14   ;;  %s776_s13 = sphi %s812_s13, %s886_s13   ;;  %s772_s12 = sphi %s810_s12, %s885_s12  }
   0x3   : > { %p35_p0 = scmp.ge.s32.totalorder %s33_s16, 2  ;;  %p647_p1 = scmp.ge.s32.totalorder %s780_s14, 1 }
   0x4   : > { %p148_p2 = scmp.lt.s32.totalorder %s780_s14, 3  ;;  %p835_p4 = scmp.eq.s32.totalorder %s645_s15, 0 }
   0x5   : > { %s888_s16 = smov (%p35_p0, %s33_s16), 0  ;;  %s782_s19 = smov [#allocation3]  }
   0x6   : > { %p831_p3 = pnand %p647_p1, %p148_p2  ;;  %s163_s20 = sshll.u32 %s782_s19, 4  ;;  %s164_s20 = int_to_ptr.vmem [resolvable:$true] %s163_s20 }
   0x7   : > { %s739_s21 = scalar_lea.vmem %s164_s20, 128  ;;  %p747_p11 = scmp.lt.s32.totalorder %s164_s20, %s164_s20 }
   0x8   : > { %p688_p5 = pneg %p831_p3  ;;  %p740_p8 = scmp.ne.s32.totalorder %s164_s20, %s739_s21 }
   0x9   : > { %p748_p12 = scmp.lt.s32.totalorder %s739_s21, %s739_s21 }
   0xa   : > { %p689_p6 = pnand %p835_p4, %p688_p5 }
   0xb   : > { %p749_p13 = por %p748_p12, %p747_p11 }
   0xc   : > { %p730_p7 = pneg %p689_p6 }
   0xe   : > { %p742_p9 = pnand %p740_p8, %p730_p7 }
  0x10   : > { %p743_p10 = pneg %p742_p9 }
  0x12   : > { %p750_p0 = pnand %p749_p13, %p743_p10 }
  0x14   : > { %753 = shalt.err (!%p750_p0)
}
  0x15   : > { %691 = dma.hbm_to_vmem [thread:$0]  (!%p689_p6), %s880_s1, 128, %s164_s20, [#allocation4]  }
  0x16   : > { %193 = sbr.rel (%p831_p3) target bundleno = 367 (0x16f), region = 32 }
  0x1b   : > { %767 = dma.done.wait (%p835_p4), [#allocation4], 128  }
  0x1c   : > { %769 = vsyncadd (%p835_p4), [#allocation4], 4294967168  ;;  %p228_p1 = scmp.lt.s32.totalorder %s772_s12, 1  ;;  %v783_v0 = vmov 0.0   ;;  %vm268_vm0 = vcmask 125952   ;;  %vm784_vm1 = vmmov 0  }
  0x1d   : > { %253 = vst [vmem:[#allocation2] sm:$0xf] %v783_v0  ;;  %669 = vmatprep.subr.mxu0 %v783_v0  ;;  %674 = vmatprep.subr.mxu1 %v783_v0  ;;  %v270_v2 = vld [vmem:[#allocation3] sm:$0x3f]  ;;  %s785_s28 = smov 124   ;;  %v786_v3 = vmov 0  }
  0x1e   : > { %s890_s12 = smov (!%p228_p1, %s772_s12), 1  ;;  %671 = vmatprep.mubr.msk.f32.mxu0 %vm784_vm1, %v783_v0  ;;  %676 = vmatprep.mubr.msk.f32.mxu1 %vm784_vm1, %v783_v0  ;;  %s787_s29 = smov 2   ;;  %v438_v6 = vld [vmem:[#allocation3] sm:$0x3f]  ;;  %v519_v7 = vld [vmem:[%s881_s2] sm:$0x3f] }
  0x1f   : > { %s653_s24 = sshll.u32 %s890_s12, 2  ;;  %273 = vrot.lane.b32.xlu1 %v270_v2, %s785_s28  ;;  %726 = vset.pattern.permute.xlu0 %v786_v3  ;;  %s788_s30 = smov 4   ;;  %vm281_vm2 = vcmask 15360   ;;  %vm286_vm3 = vcmask 1043456   ;;  %vm283_vm4 = vcmask 31744   ;;  %vm526_vm5 = vcmask 128000  }
  0x20   : > { %s234_s27 = scalar_lea.vmem %s879_s0, %s653_s24  ;;  %s789_s4 = smov 120  }
  0x21   : > { %v267_v1 = vld [vmem:[%s234_s27] sm:$0xf]  ;;  %s654_s7 = sshll.u32 %s890_s12, 3 }
  0x22   : > { %269 = vst.msk [vmem:[#allocation2 + $0x4] sm:$0xf] %vm268_vm0, %v267_v1  ;;  %s248_s10 = scalar_lea.vmem %s882_s3, %s654_s7 }
  0x29   : > { %v271_v4 = vld [vmem:[#allocation2] sm:$0xff] }
  0x2a   : > { %277 = vrot.lane.b32.xlu0 %v271_v4, %s787_s29  ;;  %v276_v5 = vcombine.high %v271_v4, %v271_v4  ;;  %359 = vrot.lane.b32.xlu1 %v271_v4, %s788_s30  ;;  %v439_v13 = vld [vmem:[#allocation2 + $0x4] sm:$0xf] }
  0x2e   : > { %279 = vrot.lane.b32.xlu0 %v276_v5, %s787_s29  ;;  %441 = vrot.lane.b32.xlu1 %v438_v6, %s789_s4 }
  0x32   : > { %361 = vrot.lane.b32.xlu0 %v276_v5, %s788_s30 }
  0x36   : > { %522 = vperm.xlu0 %726, %v519_v7  }
  0x91   : > { %v274_v8 = vpop.permute.xlu1 %273 }
  0x9c   : > { %v278_v9 = vpop.permute.xlu0 %277  ;;  %v360_v10 = vpop.permute.xlu1 %359 }
  0xa0   : > { %v280_v11 = vpop.permute.xlu0 %279  ;;  %v442_v15 = vpop.permute.xlu1 %441 }
  0xa1   : > { %v282_v12 = vsel %vm281_vm2, %v278_v9, %v280_v11 }
  0xa2   : > { %670 = vmatpush3.msk.msra.mxu0 %vm286_vm3, %v282_v12 }
  0xa3   : > { %672 = vmatmul.mubr.msk.f32.vlgmr.msra.gmra.mxu0 %vm283_vm4, %v274_v8  ;;  %679 = vmatprep.subr.mxu0 %v783_v0 }
  0xa4   : > { %v362_v14 = vpop.permute.xlu0 %361  ;;  %680 = vmatpush3.msk.msra.mxu0 %vm286_vm3, %v439_v13  ;;  %681 = vmatprep.mubr.msk.f32.mxu0 %vm784_vm1, %v783_v0 }
  0xa5   : > { %v363_v16 = vsel %vm283_vm4, %v360_v10, %v362_v14 }
  0xa6   : > { %675 = vmatpush3.msk.msra.mxu1 %vm286_vm3, %v363_v16 }
  0xa7   : > { %677 = vmatmul.mubr.msk.f32.vlgmr.msra.gmra.mxu1 %vm283_vm4, %v270_v2  ;;  %682 = vmatmul.mubr.msk.f32.vlgmr.msra.gmra.mxu0 %vm283_vm4, %v442_v15 }
  0xb1   : > { %v523_v22 = vpop.permute.xlu0 %522 }
 0x163   : > { %v355_v17 = vpop.f32.mrf.mxu0 }
 0x165   : > { %v673_v18 = vpop.f32.mrf.mxu0 }
 0x167   : > { %v434_v19 = vpop.f32.mrf.mxu1  ;;  %v514_v20 = vpop.f32.mrf.mxu0 }
 0x168   : > { %v435_v21 = vadd.f32 %v434_v19, %v355_v17 }
 0x169   : > { %v678_v23 = vpop.f32.mrf.mxu1  ;;  %v683_v24 = vpop.f32.mrf.mxu0 }
 0x16a   : > { %v518_v25 = vadd.f32 %v514_v20, %v435_v21 }
 0x16c   : > { %v525_v26 = vadd.f32 %v523_v22, %v518_v25 }
 0x16e   : > { %527 = vst.msk [vmem:[%s248_s10] sm:$0x3f] %vm526_vm5, %v525_v26 }
 0x16f PF: > { %s14_s14 = sadd.s32 1, %s780_s14   ;;  %s885_s12 = smov %s776_s13 }
 0x170   : > { %p11_p2 = scmp.ge.s32.totalorder %s14_s14, 4   ;;  %s886_s13 = smov %s888_s16 }
 0x172   :  { %13 = sbr.rel (!%p11_p2) target bundleno = 2 (0x2), region = 79 }
 0x177   :  { %559 = vsyncpa [#allocation4], 1 }
 0x178   :  { %561 = vsyncpa [#allocation4 + $0x1], 1 }

</bundles_post_ra>
